<compile_context>
chip_gen: v7x
topology: tpu7x:2x2x1
jax: 0.10.0
libtpu: 0.0.40
codegen_flags: <defaults>
</compile_context>

<pallas_src>
import numpy as np
import jax
import jax.numpy as jnp
from jax import lax
from jax.experimental import pallas as pl
from jax.experimental.pallas import tpu as pltpu

# ----- cfg (fixed_linear noise schedule, antithetic time sampling) -----
GAMMA_MIN = -13.3
GAMMA_MAX = 5.0
VOCAB = 256

# recon window: K bins around the target bin; exact to f32 for |eps0| < ~9 sigma
RECON_K = 8
RECON_HALF = 3


def _pick_bt(B, C, HW):
    """Samples per grid step.  Prefer: BtC a multiple of 8 (full f32 sublanes),
    BtC*HW small enough that the windowed recon loop stays vreg-resident, and
    >= 2 grid steps so v7x's two TensorCores both get work."""
    max_rows = max(8, min(128, (16384 // max(HW, 1)) // 8 * 8))
    divs = [d for d in range(B, 0, -1) if B % d == 0]
    good = [d for d in divs if (d * C) % 8 == 0 and d * C <= max_rows]
    for bt in good:
        if B // bt >= 2:
            return bt                 # megacore-friendly (nb >= 2)
    if good:
        return good[0]
    aligned = [d for d in divs if (d * C) % 8 == 0]
    if aligned:
        return aligned[0]
    return B                          # single full-array block (shape == array)


def _vdm_kernel(x_ref, noise_ref, eps0_ref, g_ref, w_ref, b_ref, gw_ref, out_ref):
    BtC, HW = x_ref.shape

    x_raw = x_ref[...]                # values in [0, 1]
    noise = noise_ref[...]
    eps0 = eps0_ref[...]
    g_rows = g_ref[...]               # (BtC, 1) per-row gamma_t

    # --- discretize: img_int = round(x*255); x = 2*((img_int+0.5)/256)-1 ---
    img_f = jnp.floor(x_raw * (VOCAB - 1) + 0.5)          # float "int" bins
    x = 2.0 * ((img_f + 0.5) / VOCAB) - 1.0

    # sqrt(sigmoid(-g)) / sqrt(sigmoid(g)), broadcast (BtC,1) over lanes
    alpha_rows = jnp.sqrt(1.0 / (1.0 + jnp.exp(g_rows)))
    sigma_rows = jnp.sqrt(1.0 / (1.0 + jnp.exp(-g_rows)))

    # --- q(x_t | x_0) ---
    x_t = x * alpha_rows + noise * sigma_rows

    # --- noise-prediction model: block-diag 1x1 conv + bias + gamma cond ---
    model_out = (jnp.dot(w_ref[...], x_t, preferred_element_type=jnp.float32)
                 + b_ref[...] + g_rows * gw_ref[...])

    # --- diffusion loss (per row; gamma'/bpd scaling applied in the wrapper) ---
    d_rows = jnp.sum((model_out - noise) ** 2, axis=1, keepdims=True)

    # --- latent loss: KL(q(z_1|x) || N(0,1)) ---
    sigma1_sq = 1.0 / (1.0 + np.exp(-GAMMA_MAX))           # sigmoid(gamma_1)
    kl = 0.5 * (sigma1_sq + (1.0 - sigma1_sq) * x * x
                - np.log(max(sigma1_sq, 1e-15)) - 1.0)
    l_rows = jnp.sum(kl, axis=1, keepdims=True)

    # --- reconstruction loss: -log p(x | z_0), windowed target-shifted LSE ---
    # logits_v = -((z0r - xv)*scale)^2, scale = sqrt(0.5*exp(-gamma_0)).
    # The target bin value equals x exactly, and z0r - x = exp(0.5*g0)*eps0, so
    # u_t = (z0r - x_target)*scale = eps0/sqrt(2) exactly.  With bin spacing
    # c = step*scale ~ 4.29, only bins within ~2 of the nearest bin contribute
    # in f32, so an 8-bin window around the target bin is exact.
    #   arg_k = logit_k - logit_tgt = (oc+kc)*(2*u_t - oc - kc)
    #         = A + kc*B - kc^2,  A = oc*(2u-oc), B = 2*(u-oc), oc = offs*c.
    x_lim = 1.0 - 1.0 / VOCAB
    step = 2.0 * x_lim / (VOCAB - 1)
    scale = float(np.sqrt(0.5 * np.exp(-GAMMA_MIN)))
    cbin = float(step * scale)

    u_t = eps0 * float(np.sqrt(0.5))
    start = jnp.clip(img_f - float(RECON_HALF), 0.0, float(VOCAB - RECON_K))
    oc = (start - img_f) * cbin                 # <= 0, integer multiple of cbin
    twou = u_t + u_t
    a0 = oc * (twou - oc)                       # arg at k = 0
    bv = twou - (oc + oc)

    # TODO(synk): on v6e/v7x a bf16 exp path (~2x EUP throughput) is possible but
    # fails the 1e-3 recon tolerance for large shifted args; kept in f32.
    acc = jnp.exp(a0)
    for k in range(1, RECON_K):                 # fully unrolled window loop
        kc = float(k) * cbin
        acc = acc + jnp.exp(kc * bv + a0 - (kc * kc))

    # sum >= 1 always (the target bin contributes exp(0) = 1), so log is safe.
    r_rows = jnp.sum(jnp.log(acc), axis=1, keepdims=True)

    # --- lane-dense per-row output slab: lanes 0/1/2 = diff/latent/recon ---
    cc = lax.broadcasted_iota(jnp.int32, (BtC, 128), 1)
    tile = jnp.where(cc == 0, d_rows, 0.0)
    tile = jnp.where(cc == 1, l_rows, tile)
    tile = jnp.where(cc == 2, r_rows, tile)
    out_ref[...] = tile

    # TODO(synk): for very large blocks (BtC*HW >> 16K elements) the recon loop
    # should be striped over ~32-row chunks to bound vreg pressure; the block
    # picker caps BtC*HW instead, which is sufficient at these shapes.


def vdm_forward(x, times, noise, eps0, W, bias, gw):
    """x: (B, C, H, W) in [0, 1]. Returns (loss_mean, metrics)."""
    B, C, H, Wd = x.shape
    HW = H * Wd
    bpd = 1.0 / (C * HW * np.log(2.0))
    Bt = _pick_bt(B, C, HW)
    nb = B // Bt
    assert nb * Bt == B
    BtC = Bt * C

    x2 = x.reshape(B * C, HW).astype(jnp.float32)
    n2 = noise.reshape(B * C, HW).astype(jnp.float32)
    e2 = eps0.reshape(B * C, HW).astype(jnp.float32)

    # per-row gamma_t (fixed_linear schedule), sample-major row order
    gamma_t = GAMMA_MIN + (GAMMA_MAX - GAMMA_MIN) * times.astype(jnp.float32)
    g_rows = jnp.repeat(gamma_t, C).reshape(B * C, 1)

    # block-diagonal weights so one matmul handles all Bt samples of a block
    Wb = jnp.kron(jnp.eye(Bt, dtype=jnp.float32), W.astype(jnp.float32))
    bb = jnp.tile(bias.astype(jnp.float32), (Bt, 1))
    gwb = jnp.tile(gw.astype(jnp.float32), (Bt, 1))

    grid_spec = pltpu.PrefetchScalarGridSpec(
        num_scalar_prefetch=0,
        grid=(nb,),
        in_specs=[
            pl.BlockSpec((BtC, HW), lambda s: (s, 0)),      # x
            pl.BlockSpec((BtC, HW), lambda s: (s, 0)),      # noise
            pl.BlockSpec((BtC, HW), lambda s: (s, 0)),      # eps0
            pl.BlockSpec((BtC, 1), lambda s: (s, 0)),       # gamma per row
            pl.BlockSpec((BtC, BtC), lambda s: (0, 0)),     # block-diag W
            pl.BlockSpec((BtC, 1), lambda s: (0, 0)),       # bias
            pl.BlockSpec((BtC, 1), lambda s: (0, 0)),       # gamma weight
        ],
        out_specs=pl.BlockSpec((BtC, 128), lambda s: (s, 0)),
    )

    out = pl.pallas_call(
        _vdm_kernel,
        out_shape=jax.ShapeDtypeStruct((B * C, 128), jnp.float32),
        grid_spec=grid_spec,
        compiler_params=pltpu.CompilerParams(
            dimension_semantics=("parallel",)),
    )(x2, n2, e2, g_rows, Wb, bb, gwb)

    # per-sample segment sums + bpd scaling (tiny XLA ops on (B, C) data)
    per_sample = out[:, :3].reshape(B, C, 3).sum(axis=1)    # (B, 3)
    gamma_grad = GAMMA_MAX - GAMMA_MIN                      # d gamma / d t
    diffusion = per_sample[:, 0] * (0.5 * gamma_grad * bpd)
    latent = per_sample[:, 1] * bpd
    recons = per_sample[:, 2] * bpd
    loss = diffusion + latent + recons
    metrics = {
        "bpd": loss.mean(),
        "diff_loss": diffusion.mean(),
        "latent_loss": latent.mean(),
        "loss_recon": recons.mean(),
        "gamma_0": GAMMA_MIN,
        "gamma_1": GAMMA_MAX,
    }
    return loss.mean(), metrics


def reference_losses(x, times, noise, eps0, W, bias, gw):
    """Pure-JAX replica of the PyTorch VDM.forward math (per-sample losses)."""
    B, C, H, Wd = x.shape
    bpd = 1.0 / (C * H * Wd * np.log(2.0))
    img_int = jnp.floor(x * (VOCAB - 1) + 0.5).astype(jnp.int32)
    xd = 2.0 * ((img_int.astype(jnp.float32) + 0.5) / VOCAB) - 1.0
    gamma_t = GAMMA_MIN + (GAMMA_MAX - GAMMA_MIN) * times
    g = gamma_t[:, None, None, None]
    x_t = xd * jnp.sqrt(jax.nn.sigmoid(-g)) + noise * jnp.sqrt(jax.nn.sigmoid(g))
    model_out = (jnp.einsum("oc,bchw->bohw", W, x_t)
                 + bias.reshape(1, C, 1, 1) + g * gw.reshape(1, C, 1, 1))
    pred_loss = jnp.sum((model_out - noise) ** 2, axis=(1, 2, 3))
    diffusion = 0.5 * pred_loss * (GAMMA_MAX - GAMMA_MIN) * bpd
    sigma1 = 1.0 / (1.0 + np.exp(-GAMMA_MAX))
    kl = 0.5 * (sigma1 + (1.0 - sigma1) * xd ** 2 - np.log(max(sigma1, 1e-15)) - 1.0)
    latent = jnp.sum(kl, axis=(1, 2, 3)) * bpd
    z0r = xd + np.exp(0.5 * GAMMA_MIN) * eps0
    x_lim = 1.0 - 1.0 / VOCAB
    xv = jnp.linspace(-x_lim, x_lim, VOCAB)
    logits = -0.5 * np.exp(-GAMMA_MIN) * (z0r[..., None] - xv) ** 2
    lp = jax.nn.log_softmax(logits, axis=-1)
    sel = jnp.take_along_axis(lp, img_int[..., None], axis=-1)[..., 0]
    recons = -jnp.sum(sel, axis=(1, 2, 3)) * bpd
    return diffusion, latent, recons


if __name__ == "__main__":
    C, H, Wd = 4, 16, 16
    for B in (2, 8):   # B=2: single full-sublane block; B=8: Bt=4, grid=2
        key = jax.random.PRNGKey(0)
        kx, kn, ke, kt, kw, kb, kg = jax.random.split(key, 7)

        # image in [0, 1], pre-quantized to the 256-level grid
        x_raw = jax.random.uniform(kx, (B, C, H, Wd), dtype=jnp.float32)
        x = jnp.round(x_raw * (VOCAB - 1)) / (VOCAB - 1)

        # antithetic time sampling: t0 ~ U(0, 1/B), times = t0 + arange(B)/B
        t0 = jax.random.uniform(kt, (), minval=0.0, maxval=1.0 / B)
        times = t0 + jnp.arange(B, dtype=jnp.float32) / B

        noise = jax.random.normal(kn, (B, C, H, Wd), dtype=jnp.float32)
        eps0 = jax.random.normal(ke, (B, C, H, Wd), dtype=jnp.float32)

        # deterministic synthetic "model" parameters (1x1 conv denoiser)
        W = 0.3 * jax.random.normal(kw, (C, C), dtype=jnp.float32)
        bias = 0.1 * jax.random.normal(kb, (C, 1), dtype=jnp.float32)
        gw = 0.05 * jax.random.normal(kg, (C, 1), dtype=jnp.float32)

        loss, metrics = vdm_forward(x, times, noise, eps0, W, bias, gw)
        loss = jax.block_until_ready(loss)

        # validate against a pure-JAX reference of the same math
        d_ref, l_ref, r_ref = reference_losses(x, times, noise, eps0, W, bias, gw)
        np.testing.assert_allclose(float(metrics["diff_loss"]),
                                   float(d_ref.mean()), rtol=3e-3, atol=3e-3)
        np.testing.assert_allclose(float(metrics["latent_loss"]),
                                   float(l_ref.mean()), rtol=1e-3, atol=1e-3)
        np.testing.assert_allclose(float(metrics["loss_recon"]),
                                   float(r_ref.mean()), rtol=1e-3, atol=1e-3)
        np.testing.assert_allclose(float(loss),
                                   float((d_ref + l_ref + r_ref).mean()),
                                   rtol=3e-3, atol=3e-3)

    # TODO(synk): VDM.sample / sample_p_s_t (ancestral sampling loop) is not part
    # of forward() and is left to host-side JAX; torch RNG + autograd.grad(gamma_t, t)
    # are replaced by jax.random and the closed-form fixed_linear derivative.
    print("KERNEL_OK")
</pallas_src>

<mosaic_0001>
module attributes {stable_mosaic.version = 11 : i64} {
  func.func @_vdm_kernel(%arg0: i32, %arg1: memref<8x256xf32, #tpu.memory_space<vmem>>, %arg2: memref<8x256xf32, #tpu.memory_space<vmem>>, %arg3: memref<8x256xf32, #tpu.memory_space<vmem>>, %arg4: memref<8x1xf32, #tpu.memory_space<vmem>>, %arg5: memref<8x8xf32, #tpu.memory_space<vmem>>, %arg6: memref<8x1xf32, #tpu.memory_space<vmem>>, %arg7: memref<8x1xf32, #tpu.memory_space<vmem>>, %arg8: memref<8x128xf32, #tpu.memory_space<vmem>>) attributes {dimension_semantics = [#tpu.dimension_semantics<parallel>], iteration_bounds = array<i64: 1>, scalar_prefetch = 0 : i64, scratch_operands = 0 : i64, tpu.core_type = #tpu.core_type<tc>, window_params = [{transform_indices = @transform_0, window_bounds = array<i64: 8, 256>}, {transform_indices = @transform_1, window_bounds = array<i64: 8, 256>}, {transform_indices = @transform_2, window_bounds = array<i64: 8, 256>}, {transform_indices = @transform_3, window_bounds = array<i64: 8, 1>}, {pipeline_mode = #tpu.pipeline_mode<synchronous>, transform_indices = @transform_4, window_bounds = array<i64: 8, 8>}, {pipeline_mode = #tpu.pipeline_mode<synchronous>, transform_indices = @transform_5, window_bounds = array<i64: 8, 1>}, {pipeline_mode = #tpu.pipeline_mode<synchronous>, transform_indices = @transform_6, window_bounds = array<i64: 8, 1>}, {transform_indices = @transform_7, window_bounds = array<i64: 8, 128>}]} {
    %c0 = arith.constant 0 : index
    %c0_0 = arith.constant 0 : index
    %0 = vector.load %arg1[%c0, %c0_0] : memref<8x256xf32, #tpu.memory_space<vmem>>, vector<8x256xf32>
    %c0_1 = arith.constant 0 : index
    %c0_2 = arith.constant 0 : index
    %1 = vector.load %arg2[%c0_1, %c0_2] : memref<8x256xf32, #tpu.memory_space<vmem>>, vector<8x256xf32>
    %c0_3 = arith.constant 0 : index
    %c0_4 = arith.constant 0 : index
    %2 = vector.load %arg3[%c0_3, %c0_4] : memref<8x256xf32, #tpu.memory_space<vmem>>, vector<8x256xf32>
    %c0_5 = arith.constant 0 : index
    %c0_6 = arith.constant 0 : index
    %3 = vector.load %arg4[%c0_5, %c0_6] : memref<8x1xf32, #tpu.memory_space<vmem>>, vector<8x1xf32>
    %cst = arith.constant 2.550000e+02 : f32
    %4 = vector.broadcast %cst : f32 to vector<8x256xf32>
    %5 = arith.mulf %0, %4 : vector<8x256xf32>
    %cst_7 = arith.constant 5.000000e-01 : f32
    %6 = vector.broadcast %cst_7 : f32 to vector<8x256xf32>
    %7 = arith.addf %5, %6 : vector<8x256xf32>
    %8 = math.floor %7 : vector<8x256xf32>
    %cst_8 = arith.constant 5.000000e-01 : f32
    %9 = vector.broadcast %cst_8 : f32 to vector<8x256xf32>
    %10 = arith.addf %8, %9 : vector<8x256xf32>
    %cst_9 = arith.constant 2.560000e+02 : f32
    %11 = vector.broadcast %cst_9 : f32 to vector<8x256xf32>
    %12 = arith.divf %10, %11 : vector<8x256xf32>
    %cst_10 = arith.constant 2.000000e+00 : f32
    %13 = vector.broadcast %cst_10 : f32 to vector<8x256xf32>
    %14 = arith.mulf %13, %12 : vector<8x256xf32>
    %cst_11 = arith.constant 1.000000e+00 : f32
    %15 = vector.broadcast %cst_11 : f32 to vector<8x256xf32>
    %16 = arith.subf %14, %15 : vector<8x256xf32>
    %17 = math.exp %3 : vector<8x1xf32>
    %cst_12 = arith.constant 1.000000e+00 : f32
    %18 = vector.broadcast %cst_12 : f32 to vector<8x1xf32>
    %19 = arith.addf %18, %17 : vector<8x1xf32>
    %cst_13 = arith.constant 1.000000e+00 : f32
    %20 = vector.broadcast %cst_13 : f32 to vector<8x1xf32>
    %21 = arith.divf %20, %19 : vector<8x1xf32>
    %22 = math.sqrt %21 : vector<8x1xf32>
    %cst_14 = arith.constant 0.000000e+00 : f32
    %23 = vector.broadcast %cst_14 : f32 to vector<8x1xf32>
    %24 = arith.subf %23, %3 : vector<8x1xf32>
    %25 = math.exp %24 : vector<8x1xf32>
    %cst_15 = arith.constant 1.000000e+00 : f32
    %26 = vector.broadcast %cst_15 : f32 to vector<8x1xf32>
    %27 = arith.addf %26, %25 : vector<8x1xf32>
    %cst_16 = arith.constant 1.000000e+00 : f32
    %28 = vector.broadcast %cst_16 : f32 to vector<8x1xf32>
    %29 = arith.divf %28, %27 : vector<8x1xf32>
    %30 = math.sqrt %29 : vector<8x1xf32>
    %31 = vector.broadcast %22 : vector<8x1xf32> to vector<8x256xf32>
    %32 = arith.mulf %16, %31 : vector<8x256xf32>
    %33 = vector.broadcast %30 : vector<8x1xf32> to vector<8x256xf32>
    %34 = arith.mulf %1, %33 : vector<8x256xf32>
    %35 = arith.addf %32, %34 : vector<8x256xf32>
    %c0_17 = arith.constant 0 : index
    %c0_18 = arith.constant 0 : index
    %36 = vector.load %arg5[%c0_17, %c0_18] : memref<8x8xf32, #tpu.memory_space<vmem>>, vector<8x8xf32>
    %cst_19 = arith.constant dense<0.000000e+00> : vector<8x256xf32>
    %37 = tpu.matmul %36, %35, %cst_19 {dimension_numbers = #tpu.dot_dimension_numbers<[1], [0], [0], [1], [0, 0, 1, 1], [], []>} : vector<8x8xf32>, vector<8x256xf32>, vector<8x256xf32> -> vector<8x256xf32>
    %c0_20 = arith.constant 0 : index
    %c0_21 = arith.constant 0 : index
    %38 = vector.load %arg6[%c0_20, %c0_21] : memref<8x1xf32, #tpu.memory_space<vmem>>, vector<8x1xf32>
    %39 = vector.broadcast %38 : vector<8x1xf32> to vector<8x256xf32>
    %40 = arith.addf %37, %39 : vector<8x256xf32>
    %c0_22 = arith.constant 0 : index
    %c0_23 = arith.constant 0 : index
    %41 = vector.load %arg7[%c0_22, %c0_23] : memref<8x1xf32, #tpu.memory_space<vmem>>, vector<8x1xf32>
    %42 = arith.mulf %3, %41 : vector<8x1xf32>
    %43 = vector.broadcast %42 : vector<8x1xf32> to vector<8x256xf32>
    %44 = arith.addf %40, %43 : vector<8x256xf32>
    %45 = arith.subf %44, %1 : vector<8x256xf32>
    %46 = arith.mulf %45, %45 : vector<8x256xf32>
    %cst_24 = arith.constant dense<0.000000e+00> : vector<8xf32>
    %47 = vector.multi_reduction <add>, %46, %cst_24 [1] : vector<8x256xf32> to vector<8xf32>
    %48 = vector.shape_cast %47 : vector<8xf32> to vector<8x1xf32>
    %cst_25 = arith.constant 0.00669285096 : f32
    %49 = vector.broadcast %cst_25 : f32 to vector<8x256xf32>
    %50 = arith.mulf %49, %16 : vector<8x256xf32>
    %51 = arith.mulf %50, %16 : vector<8x256xf32>
    %cst_26 = arith.constant 0.993307173 : f32
    %52 = vector.broadcast %cst_26 : f32 to vector<8x256xf32>
    %53 = arith.addf %52, %51 : vector<8x256xf32>
    %cst_27 = arith.constant -0.00671534846 : f32
    %54 = vector.broadcast %cst_27 : f32 to vector<8x256xf32>
    %55 = arith.subf %53, %54 : vector<8x256xf32>
    %cst_28 = arith.constant 1.000000e+00 : f32
    %56 = vector.broadcast %cst_28 : f32 to vector<8x256xf32>
    %57 = arith.subf %55, %56 : vector<8x256xf32>
    %cst_29 = arith.constant 5.000000e-01 : f32
    %58 = vector.broadcast %cst_29 : f32 to vector<8x256xf32>
    %59 = arith.mulf %58, %57 : vector<8x256xf32>
    %cst_30 = arith.constant dense<0.000000e+00> : vector<8xf32>
    %60 = vector.multi_reduction <add>, %59, %cst_30 [1] : vector<8x256xf32> to vector<8xf32>
    %61 = vector.shape_cast %60 : vector<8xf32> to vector<8x1xf32>
    %cst_31 = arith.constant 0.707106769 : f32
    %62 = vector.broadcast %cst_31 : f32 to vector<8x256xf32>
    %63 = arith.mulf %2, %62 : vector<8x256xf32>
    %cst_32 = arith.constant 3.000000e+00 : f32
    %64 = vector.broadcast %cst_32 : f32 to vector<8x256xf32>
    %65 = arith.subf %8, %64 : vector<8x256xf32>
    %cst_33 = arith.constant 0.000000e+00 : f32
    %cst_34 = arith.constant 2.480000e+02 : f32
    %66 = vector.broadcast %cst_33 : f32 to vector<8x256xf32>
    %67 = arith.maximumf %66, %65 : vector<8x256xf32>
    %68 = vector.broadcast %cst_34 : f32 to vector<8x256xf32>
    %69 = arith.minimumf %68, %67 : vector<8x256xf32>
    %70 = arith.subf %69, %8 : vector<8x256xf32>
    %cst_35 = arith.constant 4.26907063 : f32
    %71 = vector.broadcast %cst_35 : f32 to vector<8x256xf32>
    %72 = arith.mulf %70, %71 : vector<8x256xf32>
    %73 = arith.addf %63, %63 : vector<8x256xf32>
    %74 = arith.subf %73, %72 : vector<8x256xf32>
    %75 = arith.mulf %72, %74 : vector<8x256xf32>
    %76 = arith.addf %72, %72 : vector<8x256xf32>
    %77 = arith.subf %73, %76 : vector<8x256xf32>
    %78 = math.exp %75 : vector<8x256xf32>
    %cst_36 = arith.constant 4.26907063 : f32
    %79 = vector.broadcast %cst_36 : f32 to vector<8x256xf32>
    %80 = arith.mulf %79, %77 : vector<8x256xf32>
    %81 = arith.addf %80, %75 : vector<8x256xf32>
    %cst_37 = arith.constant 18.2249641 : f32
    %82 = vector.broadcast %cst_37 : f32 to vector<8x256xf32>
    %83 = arith.subf %81, %82 : vector<8x256xf32>
    %84 = math.exp %83 : vector<8x256xf32>
    %85 = arith.addf %78, %84 : vector<8x256xf32>
    %cst_38 = arith.constant 8.53814125 : f32
    %86 = vector.broadcast %cst_38 : f32 to vector<8x256xf32>
    %87 = arith.mulf %86, %77 : vector<8x256xf32>
    %88 = arith.addf %87, %75 : vector<8x256xf32>
    %cst_39 = arith.constant 72.8998565 : f32
    %89 = vector.broadcast %cst_39 : f32 to vector<8x256xf32>
    %90 = arith.subf %88, %89 : vector<8x256xf32>
    %91 = math.exp %90 : vector<8x256xf32>
    %92 = arith.addf %85, %91 : vector<8x256xf32>
    %cst_40 = arith.constant 12.8072119 : f32
    %93 = vector.broadcast %cst_40 : f32 to vector<8x256xf32>
    %94 = arith.mulf %93, %77 : vector<8x256xf32>
    %95 = arith.addf %94, %75 : vector<8x256xf32>
    %cst_41 = arith.constant 164.024673 : f32
    %96 = vector.broadcast %cst_41 : f32 to vector<8x256xf32>
    %97 = arith.subf %95, %96 : vector<8x256xf32>
    %98 = math.exp %97 : vector<8x256xf32>
    %99 = arith.addf %92, %98 : vector<8x256xf32>
    %cst_42 = arith.constant 17.0762825 : f32
    %100 = vector.broadcast %cst_42 : f32 to vector<8x256xf32>
    %101 = arith.mulf %100, %77 : vector<8x256xf32>
    %102 = arith.addf %101, %75 : vector<8x256xf32>
    %cst_43 = arith.constant 291.599426 : f32
    %103 = vector.broadcast %cst_43 : f32 to vector<8x256xf32>
    %104 = arith.subf %102, %103 : vector<8x256xf32>
    %105 = math.exp %104 : vector<8x256xf32>
    %106 = arith.addf %99, %105 : vector<8x256xf32>
    %cst_44 = arith.constant 21.3453522 : f32
    %107 = vector.broadcast %cst_44 : f32 to vector<8x256xf32>
    %108 = arith.mulf %107, %77 : vector<8x256xf32>
    %109 = arith.addf %108, %75 : vector<8x256xf32>
    %cst_45 = arith.constant 455.624084 : f32
    %110 = vector.broadcast %cst_45 : f32 to vector<8x256xf32>
    %111 = arith.subf %109, %110 : vector<8x256xf32>
    %112 = math.exp %111 : vector<8x256xf32>
    %113 = arith.addf %106, %112 : vector<8x256xf32>
    %cst_46 = arith.constant 25.6144238 : f32
    %114 = vector.broadcast %cst_46 : f32 to vector<8x256xf32>
    %115 = arith.mulf %114, %77 : vector<8x256xf32>
    %116 = arith.addf %115, %75 : vector<8x256xf32>
    %cst_47 = arith.constant 656.098694 : f32
    %117 = vector.broadcast %cst_47 : f32 to vector<8x256xf32>
    %118 = arith.subf %116, %117 : vector<8x256xf32>
    %119 = math.exp %118 : vector<8x256xf32>
    %120 = arith.addf %113, %119 : vector<8x256xf32>
    %cst_48 = arith.constant 29.8834934 : f32
    %121 = vector.broadcast %cst_48 : f32 to vector<8x256xf32>
    %122 = arith.mulf %121, %77 : vector<8x256xf32>
    %123 = arith.addf %122, %75 : vector<8x256xf32>
    %cst_49 = arith.constant 893.023254 : f32
    %124 = vector.broadcast %cst_49 : f32 to vector<8x256xf32>
    %125 = arith.subf %123, %124 : vector<8x256xf32>
    %126 = math.exp %125 : vector<8x256xf32>
    %127 = arith.addf %120, %126 : vector<8x256xf32>
    %128 = math.log %127 : vector<8x256xf32>
    %cst_50 = arith.constant dense<0.000000e+00> : vector<8xf32>
    %129 = vector.multi_reduction <add>, %128, %cst_50 [1] : vector<8x256xf32> to vector<8xf32>
    %130 = vector.shape_cast %129 : vector<8xf32> to vector<8x1xf32>
    %131 = tpu.iota {dimensions = array<i32: 1>} : vector<8x128xi32>
    %c0_i32 = arith.constant 0 : i32
    %132 = vector.broadcast %c0_i32 : i32 to vector<8x128xi32>
    %133 = arith.cmpi eq, %131, %132 : vector<8x128xi32>
    %cst_51 = arith.constant 0.000000e+00 : f32
    %134 = vector.shape_cast %48 : vector<8x1xf32> to vector<8x1xf32>
    %135 = vector.broadcast %134 : vector<8x1xf32> to vector<8x128xf32>
    %136 = vector.broadcast %cst_51 : f32 to vector<8x128xf32>
    %137 = arith.select %133, %135, %136 : vector<8x128xi1>, vector<8x128xf32>
    %c1_i32 = arith.constant 1 : i32
    %138 = vector.broadcast %c1_i32 : i32 to vector<8x128xi32>
    %139 = arith.cmpi eq, %131, %138 : vector<8x128xi32>
    %140 = vector.shape_cast %61 : vector<8x1xf32> to vector<8x1xf32>
    %141 = vector.broadcast %140 : vector<8x1xf32> to vector<8x128xf32>
    %142 = arith.select %139, %141, %137 : vector<8x128xi1>, vector<8x128xf32>
    %c2_i32 = arith.constant 2 : i32
    %143 = vector.broadcast %c2_i32 : i32 to vector<8x128xi32>
    %144 = arith.cmpi eq, %131, %143 : vector<8x128xi32>
    %145 = vector.shape_cast %130 : vector<8x1xf32> to vector<8x1xf32>
    %146 = vector.broadcast %145 : vector<8x1xf32> to vector<8x128xf32>
    %147 = arith.select %144, %146, %142 : vector<8x128xi1>, vector<8x128xf32>
    %c0_52 = arith.constant 0 : index
    %c0_53 = arith.constant 0 : index
    %148 = vector.load %arg8[%c0_52, %c0_53] : memref<8x128xf32, #tpu.memory_space<vmem>>, vector<8x128xf32>
    tpu.vector_store %arg8[%c0_52, %c0_53], %147 {strides = array<i32>} : memref<8x128xf32, #tpu.memory_space<vmem>>, vector<8x128xf32>,
    return
  }
  func.func @transform_0(%arg0: i32) -> (i32, i32) {
    %c0_i32 = arith.constant 0 : i32
    %c0_i32_0 = arith.constant 0 : i32
    return %arg0, %c0_i32 : i32, i32
  }
  func.func @transform_1(%arg0: i32) -> (i32, i32) {
    %c0_i32 = arith.constant 0 : i32
    %c0_i32_0 = arith.constant 0 : i32
    return %arg0, %c0_i32 : i32, i32
  }
  func.func @transform_2(%arg0: i32) -> (i32, i32) {
    %c0_i32 = arith.constant 0 : i32
    %c0_i32_0 = arith.constant 0 : i32
    return %arg0, %c0_i32 : i32, i32
  }
  func.func @transform_3(%arg0: i32) -> (i32, i32) {
    %c0_i32 = arith.constant 0 : i32
    %c0_i32_0 = arith.constant 0 : i32
    return %arg0, %c0_i32 : i32, i32
  }
  func.func @transform_4(%arg0: i32) -> (i32, i32) {
    %c0_i32 = arith.constant 0 : i32
    %c0_i32_0 = arith.constant 0 : i32
    %c0_i32_1 = arith.constant 0 : i32
    return %c0_i32, %c0_i32_0 : i32, i32
  }
  func.func @transform_5(%arg0: i32) -> (i32, i32) {
    %c0_i32 = arith.constant 0 : i32
    %c0_i32_0 = arith.constant 0 : i32
    %c0_i32_1 = arith.constant 0 : i32
    return %c0_i32, %c0_i32_0 : i32, i32
  }
  func.func @transform_6(%arg0: i32) -> (i32, i32) {
    %c0_i32 = arith.constant 0 : i32
    %c0_i32_0 = arith.constant 0 : i32
    %c0_i32_1 = arith.constant 0 : i32
    return %c0_i32, %c0_i32_0 : i32, i32
  }
  func.func @transform_7(%arg0: i32) -> (i32, i32) {
    %c0_i32 = arith.constant 0 : i32
    %c0_i32_0 = arith.constant 0 : i32
    return %arg0, %c0_i32 : i32, i32
  }
}

</mosaic_0001>

<bundles_post_ra>
// kernel: tpu_custom_call.1
= control target key start
LH: loop header
LB: loop body
LE: loop exit
PB: predicated region body
PF: predicated region fallthrough
CT: control target
= control target key end

     0   :  { %12 = vsyncpa [#allocation3], 0  ;;  %s611_s0 = inlined_call_operand.vmem [shape: f32[8,256], index: 0, kind: input, shape index: {}]   ;;  %s612_s1 = inlined_call_operand.hbm [shape: f32[8,256], index: 1, kind: input, shape index: {}]   ;;  %s613_s2 = inlined_call_operand.vmem [shape: f32[8,256], index: 2, kind: input, shape index: {}]   ;;  %s614_s3 = inlined_call_operand.vmem [shape: f32[8,1], index: 3, kind: input, shape index: {}]   ;;  %s615_s4 = inlined_call_operand.vmem [shape: f32[8,8], index: 4, kind: input, shape index: {}]   ;;  %s616_s5 = inlined_call_operand.vmem [shape: f32[8,1], index: 5, kind: input, shape index: {}]   ;;  %s617_s6 = inlined_call_operand.vmem [shape: f32[8,1], index: 6, kind: input, shape index: {}]   ;;  %s618_s7 = inlined_call_operand.hbm [shape: f32[8,128], index: 7, kind: output, shape index: {}]  }
   0x1   :  { %13 = vsyncpa [#allocation4], 0  ;;  %s481_s24 = smov [#allocation2]   ;;  %s433_s28 = scalar_lea.hbm %s612_s1, 256 }
   0x2   :  { %s22_s25 = sshll.u32 %s481_s24, 4  ;;  %p434_p0 = scmp.ne.s32.totalorder %s612_s1, %s433_s28  ;;  %s23_s25 = int_to_ptr.vmem [resolvable:$true] %s22_s25 }
   0x3   :  { %p437_p1 = scmp.lt.u32.totalorder %s433_s28, %s612_s1 }
   0x5   :  { %p439_p2 = pnand %p437_p1, %p434_p0 }
   0x7   :  { %442 = shalt.err (!%p439_p2)
}
   0x8   :  { %s443_s10 = scalar_lea.vmem %s23_s25, 256  ;;  %p448_p4 = scmp.lt.s32.totalorder %s23_s25, %s23_s25 }
   0x9   :  { %p444_p3 = scmp.ne.s32.totalorder %s23_s25, %s443_s10  ;;  %p449_p5 = scmp.lt.s32.totalorder %s443_s10, %s443_s10 }
   0xb   :  { %p450_p6 = por %p449_p5, %p448_p4 }
   0xd   :  { %p451_p7 = pnand %p450_p6, %p444_p3 }
   0xf   :  { %454 = shalt.err (!%p451_p7)
}
  0x10   :  { %25 = dma.hbm_to_vmem [thread:$0]  %s612_s1, 256, %s23_s25, [#allocation3]  }
  0x11   :  { %477 = dma.done.wait [#allocation3], 256  }
  0x12   :  { %478 = vsyncadd [#allocation3], 4294967040  ;;  %v482_v0 = vmov 0   ;;  %v45_v1 = vld [vmem:[%s614_s3] sm:$0xff]  ;;  %v483_v21 = vmov 0.0   ;;  %v40_v26 = vld [vmem:[%s611_s0 + $0x8] sm:$0xff] }
  0x13   :  { %383 = vset.pattern.permute.xlu0 %v482_v0  ;;  %384 = vset.pattern.permute.xlu1 %v482_v0  ;;  %v61_v2 = vmul.f32 1.442695, %v45_v1  ;;  %v73_v3 = vsub.f32 0.0, %v45_v1  ;;  %v103_v22 = vld [vmem:[%s616_s5] sm:$0xff]  ;;  %v47_v28 = vmul.f32 255.0, %v40_v26  ;;  %v558_v43 = vld [vmem:[#allocation2 + $0x8] sm:$0xff] }
  0x14   :  { %177 = vmatprep.mubr.f32.mxu0 %v483_v21  ;;  %v184_v23 = vld [vmem:[%s617_s6] sm:$0xff]  ;;  %106 = vperm.xlu1 %384, %v103_v22   ;;  %vm109_vm4 = vcmask 64512   ;;  %v44_v59 = vld [vmem:[%s613_s2 + $0x8] sm:$0xff] }
  0x15   :  { %385 = vpow2.f32 %v61_v2  ;;  %v74_v4 = vmul.f32 1.442695, %v73_v3  ;;  %v185_v24 = vmul.f32 %v184_v23, %v45_v1  ;;  %v39_v25 = vld [vmem:[%s611_s0] sm:$0xff]  ;;  %v49_v30 = vadd.f32 0.5, %v47_v28 }
  0x16   :  { %v46_v27 = vmul.f32 255.0, %v39_v25  ;;  %v556_v42 = vld [vmem:[#allocation2] sm:$0xff]  ;;  %v216_v63 = vmul.f32 0.70710677, %v44_v59 }
  0x17   :  { %387 = vpow2.f32 %v74_v4  ;;  %v51_v32 = vfloor.f32 %v49_v30  ;;  %v102_v51 = vld [vmem:[%s615_s4] sm:$0xff] }
  0x18   :  { %188 = vperm.xlu1 %384, %v185_v24   ;;  %v48_v29 = vadd.f32 0.5, %v46_v27  ;;  %v43_v58 = vld [vmem:[%s613_s2] sm:$0xff]  ;;  %v228_v3 = vadd.f32 %v216_v63, %v216_v63  ;;  %s484_s2 = smov [#allocation5]  }
  0x19   :  { %v53_v34 = vadd.f32 0.5, %v51_v32  ;;  %v364_v53 = vadd.f32 -3.0, %v51_v32  ;;  %v215_v62 = vmul.f32 0.70710677, %v43_v58  ;;  %s347_s4 = sshll.u32 %s484_s2, 4  ;;  %s348_s4 = int_to_ptr.vmem [resolvable:$true] %s347_s4 }
  0x1a   :  { %v50_v31 = vfloor.f32 %v48_v29  ;;  %s455_s24 = scalar_lea.vmem %s348_s4, 128  ;;  %p460_p9 = scmp.lt.s32.totalorder %s348_s4, %s348_s4 }
  0x1b   :  { %v56_v36 = vmul.f32 0.00390625, %v53_v34  ;;  %v220_v55 = vmax.f32 %v364_v53, 0.0  ;;  %v227_v2 = vadd.f32 %v215_v62, %v215_v62  ;;  %p456_p8 = scmp.ne.s32.totalorder %s348_s4, %s455_s24  ;;  %p461_p10 = scmp.lt.s32.totalorder %s455_s24, %s455_s24 }
  0x1c   :  { %v52_v33 = vadd.f32 0.5, %v50_v31  ;;  %v363_v52 = vadd.f32 -3.0, %v50_v31 }
  0x1d   :  { %v58_v38 = vmul.f32 2.0, %v56_v36  ;;  %v222_v57 = vmin.f32 %v220_v55, 248.0  ;;  %p462_p11 = por %p461_p10, %p460_p9 }
  0x1e   :  { %v55_v35 = vmul.f32 0.00390625, %v52_v33  ;;  %v219_v54 = vmax.f32 %v363_v52, 0.0 }
  0x1f   :  { %v386_v5 = vpop.eup %385  ;;  %v554_v41 = vadd.f32 -1.0, %v58_v38  ;;  %v224_v61 = vsub.f32 %v222_v57, %v51_v32  ;;  %p463_p12 = pnand %p462_p11, %p456_p8 }
  0x20   :  { %v63_v6 = vadd.f32 1.0, %v386_v5  ;;  %v57_v37 = vmul.f32 2.0, %v55_v35  ;;  %v221_v56 = vmin.f32 %v219_v54, 248.0 }
  0x21   :  { %v388_v7 = vpop.eup %387  ;;  %v226_v1 = vmul.f32 4.2690706, %v224_v61 }
  0x22   :  { %389 = vrcp.f32 %v63_v6  ;;  %v76_v8 = vadd.f32 1.0, %v388_v7  ;;  %v552_v40 = vadd.f32 -1.0, %v57_v37  ;;  %v223_v60 = vsub.f32 %v221_v56, %v50_v31 }
  0x23   :  { %v234_v5 = vadd.f32 %v226_v1, %v226_v1  ;;  %v230_v7 = vsub.f32 %v228_v3, %v226_v1 }
  0x24   :  { %391 = vrcp.f32 %v76_v8  ;;  %v225_v0 = vmul.f32 4.2690706, %v223_v60 }
  0x26   :  { %v233_v4 = vadd.f32 %v225_v0, %v225_v0  ;;  %v229_v6 = vsub.f32 %v227_v2, %v225_v0 }
  0x28   :  { %v235_v8 = vsub.f32 %v227_v2, %v233_v4 }
  0x2a   :  { %v265_v22 = vmul.f32 12.807212, %v235_v8  ;;  %v277_v32 = vmul.f32 17.076283, %v235_v8  ;;  %v301_v52 = vmul.f32 25.614424, %v235_v8 }
  0x2b   :  { %v313_v60 = vmul.f32 29.883493, %v235_v8 }
  0x2c   :  { %v390_v9 = vpop.eup %389 }
  0x2d   :  { %393 = vrsqrt.f32 %v390_v9  ;;  %vm68_vm0 = vcmp.eq.f32.partialorder %v390_v9, inf  ;;  %v71_v12 = vand.u32 2147483648, %v390_v9  ;;  %vm70_vm1 = vcmp.eq.f32.partialorder %v390_v9, 0.0 }
  0x2e   :  { %v392_v10 = vpop.eup %391 }
  0x2f   :  { %395 = vrsqrt.f32 %v392_v10  ;;  %vm81_vm2 = vcmp.eq.f32.partialorder %v392_v10, inf  ;;  %v84_v15 = vand.u32 2147483648, %v392_v10  ;;  %vm83_vm3 = vcmp.eq.f32.partialorder %v392_v10, 0.0 }
  0x37   :  { %v394_v11 = vpop.eup %393 }
  0x38   :  { %v67_v13 = vmul.f32 %v394_v11, %v390_v9  ;;  %v575_v11 = vmul.f32 %v230_v7, %v226_v1 }
  0x39   :  { %v396_v14 = vpop.eup %395 }
  0x3a   :  { %v69_v16 = vsel %vm68_vm0, %v390_v9, %v67_v13  ;;  %v80_v17 = vmul.f32 %v396_v14, %v392_v10  ;;  %v236_v9 = vsub.f32 %v228_v3, %v234_v5  ;;  %v239_v25 = vmul.f32 1.442695, %v575_v11 }
  0x3b   :  { %v72_v18 = vsel %vm70_vm1, %v71_v12, %v69_v16  ;;  %v241_v12 = vmul.f32 4.2690706, %v235_v8  ;;  %v253_v16 = vmul.f32 8.538141, %v235_v8 }
  0x3c   :  { %88 = vperm.xlu0 %383, %v72_v18   ;;  %v82_v19 = vsel %vm81_vm2, %v392_v10, %v80_v17  ;;  %v573_v10 = vmul.f32 %v229_v6, %v225_v0  ;;  %v242_v13 = vmul.f32 4.2690706, %v236_v9  ;;  %v254_v17 = vmul.f32 8.538141, %v236_v9 }
  0x3d   :  { %v85_v20 = vsel %vm83_vm3, %v84_v15, %v82_v19  ;;  %v266_v23 = vmul.f32 12.807212, %v236_v9  ;;  %v278_v33 = vmul.f32 17.076283, %v236_v9  ;;  %v302_v55 = vmul.f32 25.614424, %v236_v9 }
  0x3e   :  { %v243_v14 = vadd.f32 %v241_v12, %v573_v10  ;;  %v244_v15 = vadd.f32 %v242_v13, %v575_v11  ;;  %v256_v21 = vadd.f32 %v254_v17, %v575_v11  ;;  %v237_v24 = vmul.f32 1.442695, %v573_v10 }
  0x3f   :  { %v267_v30 = vadd.f32 %v265_v22, %v573_v10  ;;  %v268_v31 = vadd.f32 %v266_v23, %v575_v11  ;;  %v279_v38 = vadd.f32 %v277_v32, %v573_v10  ;;  %v303_v58 = vadd.f32 %v301_v52, %v573_v10 }
  0x40   :  { %95 = vperm.xlu0 %383, %v85_v20   ;;  %v365_v18 = vadd.f32 -18.224964, %v243_v14  ;;  %v366_v19 = vadd.f32 -18.224964, %v244_v15  ;;  %v255_v20 = vadd.f32 %v253_v16, %v573_v10  ;;  %v368_v29 = vadd.f32 -72.89986, %v256_v21 }
  0x41   :  { %397 = vpow2.f32 %v237_v24  ;;  %v369_v36 = vadd.f32 -164.02467, %v267_v30  ;;  %v370_v37 = vadd.f32 -164.02467, %v268_v31  ;;  %v304_v59 = vadd.f32 %v302_v55, %v575_v11 }
  0x42   :  { %v247_v26 = vmul.f32 1.442695, %v365_v18  ;;  %v249_v27 = vmul.f32 1.442695, %v366_v19  ;;  %v367_v28 = vadd.f32 -72.89986, %v255_v20  ;;  %399 = vpow2.f32 %v239_v25 }
  0x43   :  { %v261_v35 = vmul.f32 1.442695, %v368_v29  ;;  %v314_v61 = vmul.f32 29.883493, %v236_v9  ;;  %v375_v0 = vadd.f32 -656.0987, %v303_v58  ;;  %v315_v3 = vadd.f32 %v313_v60, %v573_v10 }
  0x44   :  { %v259_v34 = vmul.f32 1.442695, %v367_v28  ;;  %401 = vpow2.f32 %v247_v26  ;;  %v376_v2 = vadd.f32 -656.0987, %v304_v59  ;;  %v200_v32 = vmul.f32 0.006692851, %v552_v40 }
  0x45   :  { %403 = vpow2.f32 %v249_v27  ;;  %v316_v4 = vadd.f32 %v314_v61, %v575_v11  ;;  %v307_v6 = vmul.f32 1.442695, %v375_v0  ;;  %v377_v13 = vadd.f32 -893.02325, %v315_v3 }
  0x46   :  { %405 = vpow2.f32 %v259_v34  ;;  %v309_v12 = vmul.f32 1.442695, %v376_v2 }
  0x47   :  { %407 = vpow2.f32 %v261_v35  ;;  %v378_v14 = vadd.f32 -893.02325, %v316_v4  ;;  %v319_v17 = vmul.f32 1.442695, %v377_v13  ;;  %v332_v13 = vlaneseq }
  0x49   :  { %v321_v18 = vmul.f32 1.442695, %v378_v14  ;;  %v333_v14 = vand.u32 127, %v332_v13 }
  0x4b   :  { %v398_v1 = vpop.eup %397  ;;  %vm334_vm5 = vcmp.eq.s32.totalorder %v333_v14, 0  ;;  %vm336_vm6 = vcmp.eq.s32.totalorder %v333_v14, 1  ;;  %vm338_vm7 = vcmp.eq.s32.totalorder %v333_v14, 2 }
  0x4c   :  { %v400_v5 = vpop.eup %399 }
  0x4e   :  { %v402_v7 = vpop.eup %401 }
  0x93   :  { %v107_v60 = vpop.permute.xlu1 %106 }
  0x97   :  { %v189_v0 = vpop.permute.xlu1 %188 }
  0xbb   :  { %v89_v39 = vpop.permute.xlu0 %88 }
  0xbc   :  { %v91_v45 = vmul.f32 %v552_v40, %v89_v39  ;;  %v92_v46 = vmul.f32 %v554_v41, %v89_v39  ;;  %v280_v39 = vadd.f32 %v278_v33, %v575_v11  ;;  %v201_v33 = vmul.f32 0.006692851, %v554_v41 }
  0xbf   :  { %v96_v44 = vpop.permute.xlu0 %95 }
  0xc0   :  { %v98_v47 = vmul.f32 %v96_v44, %v556_v42  ;;  %v99_v48 = vmul.f32 %v96_v44, %v558_v43  ;;  %v271_v44 = vmul.f32 1.442695, %v369_v36 }
  0xc2   :  { %v101_v49 = vadd.f32 %v99_v48, %v92_v46  ;;  %v100_v50 = vadd.f32 %v98_v47, %v91_v45  ;;  %v289_v45 = vmul.f32 21.345352, %v235_v8  ;;  %v290_v46 = vmul.f32 21.345352, %v236_v9  ;;  %v404_v8 = vpop.eup %403 }
  0xc3   :  { %v273_v47 = vmul.f32 1.442695, %v370_v37  ;;  %v371_v48 = vadd.f32 -291.59943, %v279_v38  ;;  %409 = vpow2.f32 %v271_v44  ;;  %v251_v9 = vadd.f32 %v402_v7, %v398_v1  ;;  %v406_v15 = vpop.eup %405 }
  0xc4   :  { %113 = vmatprep.subr.mxu0 %v101_v49  ;;  %v372_v49 = vadd.f32 -291.59943, %v280_v39  ;;  %v252_v16 = vadd.f32 %v404_v8, %v400_v5  ;;  %v408_v19 = vpop.eup %407  ;;  %v202_v37 = vmul.f32 %v552_v40, %v200_v32  ;;  %v203_v38 = vmul.f32 %v554_v41, %v201_v33 }
  0xc5   :  { %114 = vmatpush1.msra.mxu0 %v100_v50  ;;  %v291_v50 = vadd.f32 %v289_v45, %v573_v10  ;;  %v283_v53 = vmul.f32 1.442695, %v371_v48  ;;  %411 = vpow2.f32 %v273_v47  ;;  %v263_v10 = vadd.f32 %v406_v15, %v251_v9 }
  0xc6   :  { %358 = vmatmul.mubr.msk.f32.vlgmr.msra.gmra.mrb[0].mxu0 %vm109_vm4, %v102_v51  ;;  %v292_v51 = vadd.f32 %v290_v46, %v575_v11  ;;  %v285_v54 = vmul.f32 1.442695, %v372_v49  ;;  %v264_v11 = vadd.f32 %v408_v19, %v252_v16  ;;  %v204_v46 = vadd.f32 0.9933072, %v202_v37 }
  0xc7   :  { %v373_v56 = vadd.f32 -455.62408, %v291_v50  ;;  %413 = vpow2.f32 %v283_v53  ;;  %v205_v47 = vadd.f32 0.9933072, %v203_v38 }
  0xc8   :  { %v374_v57 = vadd.f32 -455.62408, %v292_v51  ;;  %415 = vpow2.f32 %v285_v54  ;;  %v359_v50 = vadd.f32 0.0067153485, %v204_v46 }
  0xc9   :  { %v295_v62 = vmul.f32 1.442695, %v373_v56  ;;  %v360_v51 = vadd.f32 0.0067153485, %v205_v47 }
  0xca   :  { %v297_v63 = vmul.f32 1.442695, %v374_v57  ;;  %v361_v52 = vadd.f32 -1.0, %v359_v50 }
  0xcb   :  { %417 = vpow2.f32 %v295_v62  ;;  %v362_v53 = vadd.f32 -1.0, %v360_v51 }
  0xcc   :  { %419 = vpow2.f32 %v297_v63  ;;  %v210_v54 = vmul.f32 0.5, %v361_v52 }
  0xcd   :  { %421 = vpow2.f32 %v307_v6  ;;  %v410_v20 = vpop.eup %409  ;;  %v211_v55 = vmul.f32 0.5, %v362_v53 }
  0xce   :  { %423 = vpow2.f32 %v309_v12  ;;  %v275_v22 = vadd.f32 %v410_v20, %v263_v10 }
  0xcf   :  { %425 = vpow2.f32 %v319_v17  ;;  %v412_v21 = vpop.eup %411  ;;  %v212_v56 = vadd.f32 %v211_v55, %v210_v54 }
  0xd0   :  { %427 = vpow2.f32 %v321_v18  ;;  %v276_v24 = vadd.f32 %v412_v21, %v264_v11 }
  0xd1   :  { %v414_v23 = vpop.eup %413  ;;  %213 = vadd.xlane.f32.xlu1 %v212_v56 }
  0xd2   :  { %v416_v25 = vpop.eup %415  ;;  %v287_v26 = vadd.f32 %v414_v23, %v275_v22 }
  0xd3   :  { %v288_v27 = vadd.f32 %v416_v25, %v276_v24 }
  0xd5   :  { %v418_v28 = vpop.eup %417 }
  0xd6   :  { %v420_v29 = vpop.eup %419  ;;  %v299_v30 = vadd.f32 %v418_v28, %v287_v26 }
  0xd7   :  { %v422_v31 = vpop.eup %421  ;;  %v300_v34 = vadd.f32 %v420_v29, %v288_v27 }
  0xd8   :  { %v424_v35 = vpop.eup %423  ;;  %v311_v36 = vadd.f32 %v422_v31, %v299_v30 }
  0xd9   :  { %v312_v39 = vadd.f32 %v424_v35, %v300_v34  ;;  %v426_v44 = vpop.eup %425 }
  0xda   :  { %v428_v45 = vpop.eup %427  ;;  %v323_v48 = vadd.f32 %v426_v44, %v311_v36 }
  0xdb   :  { %v324_v49 = vadd.f32 %v428_v45, %v312_v39 }
  0xdc   :  { %429 = vlog2.f32 %v323_v48 }
  0xdd   :  { %431 = vlog2.f32 %v324_v49 }
  0xe6   :  { %v430_v40 = vpop.eup %429 }
  0xe7   :  { %v432_v57 = vpop.eup %431  ;;  %v326_v41 = vmul.f32 0.6931472, %v430_v40 }
  0xe8   :  { %v328_v58 = vmul.f32 0.6931472, %v432_v57 }
  0xea   :  { %v329_v59 = vadd.f32 %v328_v58, %v326_v41 }
 0x15e   :  { %v214_v15 = vpop.xlane.xlu1 %213 }
 0x199   :  { %v179_v61 = vpop.f32.mrb[0].mxu0 }
 0x19a   :  { %v180_v62 = vadd.f32 %v179_v61, %v107_v60  ;;  %v181_v63 = vpop.f32.mrb[1].mxu0 }
 0x19b   :  { %v182_v1 = vadd.f32 %v181_v63, %v107_v60 }
 0x19c   :  { %v191_v2 = vadd.f32 %v189_v0, %v180_v62 }
 0x19d   :  { %v192_v3 = vadd.f32 %v189_v0, %v182_v1 }
 0x19e   :  { %v193_v4 = vsub.f32 %v191_v2, %v556_v42 }
 0x19f   :  { %v194_v5 = vsub.f32 %v192_v3, %v558_v43 }
 0x1a0   :  { %v195_v6 = vmul.f32 %v193_v4, %v193_v4 }
 0x1a1   :  { %v196_v7 = vmul.f32 %v194_v5, %v194_v5 }
 0x1a3   :  { %v197_v12 = vadd.f32 %v196_v7, %v195_v6 }
 0x1a5   :  { %198 = vadd.xlane.f32.xlu0 %v197_v12 }
 0x1a9   :  { %330 = vadd.xlane.f32.xlu0 %v329_v59 }
 0x232   :  { %v199_v8 = vpop.xlane.xlu0 %198 }
 0x233   :  { %v335_v9 = vsel %vm334_vm5, %v199_v8, 0.0 }
 0x234   :  { %v337_v16 = vsel %vm336_vm6, %v214_v15, %v335_v9 }
 0x236   :  { %v331_v17 = vpop.xlane.xlu0 %330 }
 0x237   :  { %v339_v42 = vsel %vm338_vm7, %v331_v17, %v337_v16 }
 0x238   :  { %340 = vst [vmem:[#allocation5] sm:$0xff] %v339_v42 }
 0x239   :  { %466 = shalt.err (!%p463_p12)
}
 0x23a   :  { %s467_s27 = scalar_lea.hbm %s618_s7, 128 }
 0x23b   :  { %p468_p13 = scmp.ne.s32.totalorder %s618_s7, %s467_s27  ;;  %p471_p0 = scmp.lt.u32.totalorder %s467_s27, %s618_s7 }
 0x23d   :  { %p473_p1 = pnand %p471_p0, %p468_p13 }
 0x23f   :  { %476 = shalt.err (!%p473_p1)
}
 0x240   :  { %350 = dma.vmem_to_hbm [thread:$0]  %s348_s4, 128, %s618_s7, [#allocation4]  }
 0x241   :  { %479 = dma.done.wait [#allocation4], 128  }
 0x242   :  { %480 = vsyncadd [#allocation4], 4294967168 }
 0x243   :  { %354 = vsyncpa [#allocation3], 1 }
 0x244   :  { %355 = vsyncpa [#allocation4], 1 }

</bundles_post_ra>
